<compile_context>
chip_gen: v7x
topology: tpu7x:2x2x1
jax: 0.10.0
libtpu: 0.0.40
codegen_flags: <defaults>
</compile_context>

<pallas_src>
import functools

import jax
import jax.numpy as jnp
from jax.experimental import pallas as pl
from jax.experimental.pallas import tpu as pltpu

LANES = 128        # lane-dense width for activations (pad feature axis to a full vreg)
NUM_LAYERS = 4


def fused_gin_kernel(a_ref, x_ref, w1_ref, b1_ref, w2_ref, b2_ref, o_ref):
    """All 4 GINConv layers fused; A_hat and intermediates never leave on-chip memory."""
    a = a_ref[...]                     # (N, N) bf16, A_hat[dst, src] = multiplicity (+I)
    h_bf = x_ref[...]                  # (N, 128) bf16, lanes beyond true feature dim are 0
    h = None

    for layer in range(NUM_LAYERS):   # statically unrolled
        w1 = w1_ref[layer]             # (128, HID_PAD) bf16
        b1 = b1_ref[layer]             # (1, HID_PAD)  f32
        w2 = w2_ref[layer]             # (HID_PAD, 128) bf16
        b2 = b2_ref[layer]             # (1, 128)      f32

        # z = (1+eps)*h + sum-aggregation, with eps=0 folded into A_hat = A + I.
        z = jnp.dot(a, h_bf, preferred_element_type=jnp.float32)       # (N, 128) f32

        t = jnp.dot(z.astype(jnp.bfloat16), w1,
                    preferred_element_type=jnp.float32) + b1           # (N, HID_PAD)
        t = jnp.maximum(t, 0.0)
        # TODO(synk): nn.Dropout is identity in eval mode; training-mode dropout not implemented.
        h = jnp.dot(t.astype(jnp.bfloat16), w2,
                    preferred_element_type=jnp.float32) + b2           # (N, 128) f32
        h = jnp.maximum(h, 0.0)
        h_bf = h.astype(jnp.bfloat16)  # carried in bf16 for the next aggregation matmul

    o_ref[...] = h                     # lane-dense (N, 128) f32, unmasked store


def _pad2d(t, rows, cols):
    r, c = t.shape
    return jnp.pad(t, ((0, rows - r), (0, cols - c)))


# ----------------------------- one-time preprocessing -----------------------------

def build_adjacency(edges, num_nodes):
    """A_hat[dst, src] = multiplicity of edge src -> dst, plus I (eps=0 self term).

    Built ONCE per graph (the scatter is slow on TPU); exact in bf16 for
    multiplicities <= 256.
    """
    src = edges[0]
    dst = edges[1]
    a = jnp.zeros((num_nodes, num_nodes), jnp.float32)
    a = a.at[dst, src].add(1.0)
    a = a + jnp.eye(num_nodes, dtype=jnp.float32)
    return a.astype(jnp.bfloat16)


def prepare_params(params, hidden1_dim, hidden2_dim):
    """Pad/cast/stack the 4x(W1,b1,W2,b2) params ONCE, outside the per-call path."""
    hid_pad = ((max(hidden1_dim, hidden2_dim) + 7) // 8) * 8
    w1s, b1s, w2s, b2s = [], [], [], []
    for (w1, b1, w2, b2) in params:
        w1s.append(_pad2d(w1, LANES, hid_pad).astype(jnp.bfloat16))   # (128, HID_PAD)
        b1s.append(_pad2d(b1.reshape(1, -1), 1, hid_pad))             # (1,   HID_PAD) f32
        w2s.append(_pad2d(w2, hid_pad, LANES).astype(jnp.bfloat16))   # (HID_PAD, 128)
        b2s.append(_pad2d(b2.reshape(1, -1), 1, LANES))               # (1,   128)     f32
    return (jnp.stack(w1s), jnp.stack(b1s), jnp.stack(w2s), jnp.stack(b2s))


# ---------------------------------- forward pass ----------------------------------

@functools.partial(jax.jit, static_argnames=("out_dim",))
def gnn_forward(x, a_hat, packed, out_dim):
    w1s, b1s, w2s, b2s = packed
    n = a_hat.shape[0]
    hid_pad = w1s.shape[-1]

    x_p = _pad2d(x, n, LANES).astype(jnp.bfloat16)   # (N, 128) bf16, zero-padded lanes

    full = lambda shape: pl.BlockSpec(shape, lambda: (0,) * len(shape))

    flops = 2 * NUM_LAYERS * (n * n * LANES + n * LANES * hid_pad + n * hid_pad * LANES)
    bytes_accessed = (a_hat.size * 2 + x_p.size * 2
                      + w1s.size * 2 + w2s.size * 2
                      + b1s.size * 4 + b2s.size * 4
                      + n * LANES * 4)

    out_padded = pl.pallas_call(
        fused_gin_kernel,
        out_shape=jax.ShapeDtypeStruct((n, LANES), jnp.float32),
        in_specs=[full(a_hat.shape), full(x_p.shape),
                  full(w1s.shape), full(b1s.shape),
                  full(w2s.shape), full(b2s.shape)],
        out_specs=full((n, LANES)),
        compiler_params=pltpu.CompilerParams(dimension_semantics=()),
        cost_estimate=pl.CostEstimate(flops=flops, transcendentals=0,
                                      bytes_accessed=bytes_accessed),
    )(a_hat, x_p, w1s, b1s, w2s, b2s)

    return out_padded[:, :out_dim]


# ------------------------------- init & reference --------------------------------

def init_linear(key, fan_in, fan_out):
    """Deterministic PyTorch-Linear-style init (kaiming-uniform-ish bounds)."""
    kw, kb = jax.random.split(key)
    bound = 1.0 / jnp.sqrt(jnp.float32(fan_in))
    w = jax.random.uniform(kw, (fan_in, fan_out), jnp.float32, -bound, bound)
    b = jax.random.uniform(kb, (fan_out,), jnp.float32, -bound, bound)
    return w, b


def init_gnn_params(key, in_dim, hidden1_dim, hidden2_dim):
    dims = [
        (in_dim, hidden1_dim, hidden1_dim),
        (hidden1_dim, hidden2_dim, hidden2_dim),
        (hidden2_dim, hidden2_dim, hidden2_dim),
        (hidden2_dim, hidden2_dim, hidden2_dim),
    ]
    params = []
    keys = jax.random.split(key, 2 * len(dims))
    for i, (d_in, d_hid, d_out) in enumerate(dims):
        w1, b1 = init_linear(keys[2 * i], d_in, d_hid)
        w2, b2 = init_linear(keys[2 * i + 1], d_hid, d_out)
        params.append((w1, b1, w2, b2))
    return params


def gnn_reference(x, edges, params, num_nodes):
    """Pure-JAX f32 reference of the PyTorch GIN stack (eval mode)."""
    src, dst = edges[0], edges[1]
    a = jnp.zeros((num_nodes, num_nodes), jnp.float32).at[dst, src].add(1.0)
    h = x
    for (w1, b1, w2, b2) in params:
        z = h + a @ h
        t = jnp.maximum(z @ w1 + b1, 0.0)
        h = jnp.maximum(t @ w2 + b2, 0.0)
    return h


if __name__ == "__main__":
    key = jax.random.PRNGKey(0)
    k_x, k_e, k_p = jax.random.split(key, 3)

    N = 64          # number of nodes
    E = 256         # number of edges
    IN_DIM = 16
    HID1 = 32
    HID2 = 32

    x = jax.random.normal(k_x, (N, IN_DIM), jnp.float32)
    edges = jax.random.randint(k_e, (2, E), 0, N, jnp.int32)  # row 0 = src, row 1 = dst

    params = init_gnn_params(k_p, IN_DIM, HID1, HID2)

    # One-time preprocessing, hoisted out of the per-call path.
    a_hat = jax.block_until_ready(build_adjacency(edges, N))
    packed = jax.block_until_ready(prepare_params(params, HID1, HID2))

    out = gnn_forward(x, a_hat, packed, out_dim=HID2)
    out = jax.block_until_ready(out)

    assert out.shape == (N, HID2), out.shape
    assert bool(jnp.all(jnp.isfinite(out)))

    # Loose sanity check vs. the f32 reference (kernel runs bf16 matmuls).
    ref = gnn_reference(x, edges, params, N)
    scale = float(jnp.max(jnp.abs(ref))) + 1e-6
    rel_err = float(jnp.max(jnp.abs(out - ref))) / scale
    assert rel_err < 0.1, f"relative error too large: {rel_err}"

    print("KERNEL_OK")
</pallas_src>

<mosaic_0001>
module attributes {stable_mosaic.version = 11 : i64} {
  func.func @fused_gin_kernel(%arg0: memref<64x64xbf16, #tpu.memory_space<vmem>>, %arg1: memref<64x128xbf16, #tpu.memory_space<vmem>>, %arg2: memref<4x128x32xbf16, #tpu.memory_space<vmem>>, %arg3: memref<4x1x32xf32, #tpu.memory_space<vmem>>, %arg4: memref<4x32x128xbf16, #tpu.memory_space<vmem>>, %arg5: memref<4x1x128xf32, #tpu.memory_space<vmem>>, %arg6: memref<64x128xf32, #tpu.memory_space<vmem>>) attributes {dimension_semantics = [], scalar_prefetch = 0 : i64, scratch_operands = 0 : i64, tpu.core_type = #tpu.core_type<tc>} {
    %c0 = arith.constant 0 : index
    %c0_0 = arith.constant 0 : index
    %0 = vector.load %arg0[%c0, %c0_0] : memref<64x64xbf16, #tpu.memory_space<vmem>>, vector<64x64xbf16>
    %c0_1 = arith.constant 0 : index
    %c0_2 = arith.constant 0 : index
    %1 = vector.load %arg1[%c0_1, %c0_2] : memref<64x128xbf16, #tpu.memory_space<vmem>>, vector<64x128xbf16>
    %c0_3 = arith.constant 0 : index
    %c0_4 = arith.constant 0 : index
    %c0_5 = arith.constant 0 : index
    %2 = vector.load %arg2[%c0_3, %c0_4, %c0_5] : memref<4x128x32xbf16, #tpu.memory_space<vmem>>, vector<1x128x32xbf16>
    %3 = vector.shape_cast %2 : vector<1x128x32xbf16> to vector<128x32xbf16>
    %c0_6 = arith.constant 0 : index
    %c0_7 = arith.constant 0 : index
    %c0_8 = arith.constant 0 : index
    %4 = vector.load %arg3[%c0_6, %c0_7, %c0_8] : memref<4x1x32xf32, #tpu.memory_space<vmem>>, vector<1x1x32xf32>
    %5 = vector.shape_cast %4 : vector<1x1x32xf32> to vector<1x32xf32>
    %c0_9 = arith.constant 0 : index
    %c0_10 = arith.constant 0 : index
    %c0_11 = arith.constant 0 : index
    %6 = vector.load %arg4[%c0_9, %c0_10, %c0_11] : memref<4x32x128xbf16, #tpu.memory_space<vmem>>, vector<1x32x128xbf16>
    %7 = vector.shape_cast %6 : vector<1x32x128xbf16> to vector<32x128xbf16>
    %c0_12 = arith.constant 0 : index
    %c0_13 = arith.constant 0 : index
    %c0_14 = arith.constant 0 : index
    %8 = vector.load %arg5[%c0_12, %c0_13, %c0_14] : memref<4x1x128xf32, #tpu.memory_space<vmem>>, vector<1x1x128xf32>
    %9 = vector.shape_cast %8 : vector<1x1x128xf32> to vector<1x128xf32>
    %cst = arith.constant dense<0.000000e+00> : vector<64x128xf32>
    %10 = tpu.matmul %0, %1, %cst {dimension_numbers = #tpu.dot_dimension_numbers<[1], [0], [0], [1], [0, 0, 1, 1], [], []>} : vector<64x64xbf16>, vector<64x128xbf16>, vector<64x128xf32> -> vector<64x128xf32>
    %11 = arith.truncf %10 : vector<64x128xf32> to vector<64x128xbf16>
    %cst_15 = arith.constant dense<0.000000e+00> : vector<64x32xf32>
    %12 = tpu.matmul %11, %3, %cst_15 {dimension_numbers = #tpu.dot_dimension_numbers<[1], [0], [0], [1], [0, 0, 1, 1], [], []>} : vector<64x128xbf16>, vector<128x32xbf16>, vector<64x32xf32> -> vector<64x32xf32>
    %13 = vector.broadcast %5 : vector<1x32xf32> to vector<64x32xf32>
    %14 = arith.addf %12, %13 : vector<64x32xf32>
    %cst_16 = arith.constant 0.000000e+00 : f32
    %15 = vector.broadcast %cst_16 : f32 to vector<64x32xf32>
    %16 = arith.maximumf %14, %15 : vector<64x32xf32>
    %17 = arith.truncf %16 : vector<64x32xf32> to vector<64x32xbf16>
    %cst_17 = arith.constant dense<0.000000e+00> : vector<64x128xf32>
    %18 = tpu.matmul %17, %7, %cst_17 {dimension_numbers = #tpu.dot_dimension_numbers<[1], [0], [0], [1], [0, 0, 1, 1], [], []>} : vector<64x32xbf16>, vector<32x128xbf16>, vector<64x128xf32> -> vector<64x128xf32>
    %19 = vector.broadcast %9 : vector<1x128xf32> to vector<64x128xf32>
    %20 = arith.addf %18, %19 : vector<64x128xf32>
    %cst_18 = arith.constant 0.000000e+00 : f32
    %21 = vector.broadcast %cst_18 : f32 to vector<64x128xf32>
    %22 = arith.maximumf %20, %21 : vector<64x128xf32>
    %23 = arith.truncf %22 : vector<64x128xf32> to vector<64x128xbf16>
    %c1 = arith.constant 1 : index
    %c0_19 = arith.constant 0 : index
    %c0_20 = arith.constant 0 : index
    %24 = vector.load %arg2[%c1, %c0_19, %c0_20] : memref<4x128x32xbf16, #tpu.memory_space<vmem>>, vector<1x128x32xbf16>
    %25 = vector.shape_cast %24 : vector<1x128x32xbf16> to vector<128x32xbf16>
    %c1_21 = arith.constant 1 : index
    %c0_22 = arith.constant 0 : index
    %c0_23 = arith.constant 0 : index
    %26 = vector.load %arg3[%c1_21, %c0_22, %c0_23] : memref<4x1x32xf32, #tpu.memory_space<vmem>>, vector<1x1x32xf32>
    %27 = vector.shape_cast %26 : vector<1x1x32xf32> to vector<1x32xf32>
    %c1_24 = arith.constant 1 : index
    %c0_25 = arith.constant 0 : index
    %c0_26 = arith.constant 0 : index
    %28 = vector.load %arg4[%c1_24, %c0_25, %c0_26] : memref<4x32x128xbf16, #tpu.memory_space<vmem>>, vector<1x32x128xbf16>
    %29 = vector.shape_cast %28 : vector<1x32x128xbf16> to vector<32x128xbf16>
    %c1_27 = arith.constant 1 : index
    %c0_28 = arith.constant 0 : index
    %c0_29 = arith.constant 0 : index
    %30 = vector.load %arg5[%c1_27, %c0_28, %c0_29] : memref<4x1x128xf32, #tpu.memory_space<vmem>>, vector<1x1x128xf32>
    %31 = vector.shape_cast %30 : vector<1x1x128xf32> to vector<1x128xf32>
    %cst_30 = arith.constant dense<0.000000e+00> : vector<64x128xf32>
    %32 = tpu.matmul %0, %23, %cst_30 {dimension_numbers = #tpu.dot_dimension_numbers<[1], [0], [0], [1], [0, 0, 1, 1], [], []>} : vector<64x64xbf16>, vector<64x128xbf16>, vector<64x128xf32> -> vector<64x128xf32>
    %33 = arith.truncf %32 : vector<64x128xf32> to vector<64x128xbf16>
    %cst_31 = arith.constant dense<0.000000e+00> : vector<64x32xf32>
    %34 = tpu.matmul %33, %25, %cst_31 {dimension_numbers = #tpu.dot_dimension_numbers<[1], [0], [0], [1], [0, 0, 1, 1], [], []>} : vector<64x128xbf16>, vector<128x32xbf16>, vector<64x32xf32> -> vector<64x32xf32>
    %35 = vector.broadcast %27 : vector<1x32xf32> to vector<64x32xf32>
    %36 = arith.addf %34, %35 : vector<64x32xf32>
    %cst_32 = arith.constant 0.000000e+00 : f32
    %37 = vector.broadcast %cst_32 : f32 to vector<64x32xf32>
    %38 = arith.maximumf %36, %37 : vector<64x32xf32>
    %39 = arith.truncf %38 : vector<64x32xf32> to vector<64x32xbf16>
    %cst_33 = arith.constant dense<0.000000e+00> : vector<64x128xf32>
    %40 = tpu.matmul %39, %29, %cst_33 {dimension_numbers = #tpu.dot_dimension_numbers<[1], [0], [0], [1], [0, 0, 1, 1], [], []>} : vector<64x32xbf16>, vector<32x128xbf16>, vector<64x128xf32> -> vector<64x128xf32>
    %41 = vector.broadcast %31 : vector<1x128xf32> to vector<64x128xf32>
    %42 = arith.addf %40, %41 : vector<64x128xf32>
    %cst_34 = arith.constant 0.000000e+00 : f32
    %43 = vector.broadcast %cst_34 : f32 to vector<64x128xf32>
    %44 = arith.maximumf %42, %43 : vector<64x128xf32>
    %45 = arith.truncf %44 : vector<64x128xf32> to vector<64x128xbf16>
    %c2 = arith.constant 2 : index
    %c0_35 = arith.constant 0 : index
    %c0_36 = arith.constant 0 : index
    %46 = vector.load %arg2[%c2, %c0_35, %c0_36] : memref<4x128x32xbf16, #tpu.memory_space<vmem>>, vector<1x128x32xbf16>
    %47 = vector.shape_cast %46 : vector<1x128x32xbf16> to vector<128x32xbf16>
    %c2_37 = arith.constant 2 : index
    %c0_38 = arith.constant 0 : index
    %c0_39 = arith.constant 0 : index
    %48 = vector.load %arg3[%c2_37, %c0_38, %c0_39] : memref<4x1x32xf32, #tpu.memory_space<vmem>>, vector<1x1x32xf32>
    %49 = vector.shape_cast %48 : vector<1x1x32xf32> to vector<1x32xf32>
    %c2_40 = arith.constant 2 : index
    %c0_41 = arith.constant 0 : index
    %c0_42 = arith.constant 0 : index
    %50 = vector.load %arg4[%c2_40, %c0_41, %c0_42] : memref<4x32x128xbf16, #tpu.memory_space<vmem>>, vector<1x32x128xbf16>
    %51 = vector.shape_cast %50 : vector<1x32x128xbf16> to vector<32x128xbf16>
    %c2_43 = arith.constant 2 : index
    %c0_44 = arith.constant 0 : index
    %c0_45 = arith.constant 0 : index
    %52 = vector.load %arg5[%c2_43, %c0_44, %c0_45] : memref<4x1x128xf32, #tpu.memory_space<vmem>>, vector<1x1x128xf32>
    %53 = vector.shape_cast %52 : vector<1x1x128xf32> to vector<1x128xf32>
    %cst_46 = arith.constant dense<0.000000e+00> : vector<64x128xf32>
    %54 = tpu.matmul %0, %45, %cst_46 {dimension_numbers = #tpu.dot_dimension_numbers<[1], [0], [0], [1], [0, 0, 1, 1], [], []>} : vector<64x64xbf16>, vector<64x128xbf16>, vector<64x128xf32> -> vector<64x128xf32>
    %55 = arith.truncf %54 : vector<64x128xf32> to vector<64x128xbf16>
    %cst_47 = arith.constant dense<0.000000e+00> : vector<64x32xf32>
    %56 = tpu.matmul %55, %47, %cst_47 {dimension_numbers = #tpu.dot_dimension_numbers<[1], [0], [0], [1], [0, 0, 1, 1], [], []>} : vector<64x128xbf16>, vector<128x32xbf16>, vector<64x32xf32> -> vector<64x32xf32>
    %57 = vector.broadcast %49 : vector<1x32xf32> to vector<64x32xf32>
    %58 = arith.addf %56, %57 : vector<64x32xf32>
    %cst_48 = arith.constant 0.000000e+00 : f32
    %59 = vector.broadcast %cst_48 : f32 to vector<64x32xf32>
    %60 = arith.maximumf %58, %59 : vector<64x32xf32>
    %61 = arith.truncf %60 : vector<64x32xf32> to vector<64x32xbf16>
    %cst_49 = arith.constant dense<0.000000e+00> : vector<64x128xf32>
    %62 = tpu.matmul %61, %51, %cst_49 {dimension_numbers = #tpu.dot_dimension_numbers<[1], [0], [0], [1], [0, 0, 1, 1], [], []>} : vector<64x32xbf16>, vector<32x128xbf16>, vector<64x128xf32> -> vector<64x128xf32>
    %63 = vector.broadcast %53 : vector<1x128xf32> to vector<64x128xf32>
    %64 = arith.addf %62, %63 : vector<64x128xf32>
    %cst_50 = arith.constant 0.000000e+00 : f32
    %65 = vector.broadcast %cst_50 : f32 to vector<64x128xf32>
    %66 = arith.maximumf %64, %65 : vector<64x128xf32>
    %67 = arith.truncf %66 : vector<64x128xf32> to vector<64x128xbf16>
    %c3 = arith.constant 3 : index
    %c0_51 = arith.constant 0 : index
    %c0_52 = arith.constant 0 : index
    %68 = vector.load %arg2[%c3, %c0_51, %c0_52] : memref<4x128x32xbf16, #tpu.memory_space<vmem>>, vector<1x128x32xbf16>
    %69 = vector.shape_cast %68 : vector<1x128x32xbf16> to vector<128x32xbf16>
    %c3_53 = arith.constant 3 : index
    %c0_54 = arith.constant 0 : index
    %c0_55 = arith.constant 0 : index
    %70 = vector.load %arg3[%c3_53, %c0_54, %c0_55] : memref<4x1x32xf32, #tpu.memory_space<vmem>>, vector<1x1x32xf32>
    %71 = vector.shape_cast %70 : vector<1x1x32xf32> to vector<1x32xf32>
    %c3_56 = arith.constant 3 : index
    %c0_57 = arith.constant 0 : index
    %c0_58 = arith.constant 0 : index
    %72 = vector.load %arg4[%c3_56, %c0_57, %c0_58] : memref<4x32x128xbf16, #tpu.memory_space<vmem>>, vector<1x32x128xbf16>
    %73 = vector.shape_cast %72 : vector<1x32x128xbf16> to vector<32x128xbf16>
    %c3_59 = arith.constant 3 : index
    %c0_60 = arith.constant 0 : index
    %c0_61 = arith.constant 0 : index
    %74 = vector.load %arg5[%c3_59, %c0_60, %c0_61] : memref<4x1x128xf32, #tpu.memory_space<vmem>>, vector<1x1x128xf32>
    %75 = vector.shape_cast %74 : vector<1x1x128xf32> to vector<1x128xf32>
    %cst_62 = arith.constant dense<0.000000e+00> : vector<64x128xf32>
    %76 = tpu.matmul %0, %67, %cst_62 {dimension_numbers = #tpu.dot_dimension_numbers<[1], [0], [0], [1], [0, 0, 1, 1], [], []>} : vector<64x64xbf16>, vector<64x128xbf16>, vector<64x128xf32> -> vector<64x128xf32>
    %77 = arith.truncf %76 : vector<64x128xf32> to vector<64x128xbf16>
    %cst_63 = arith.constant dense<0.000000e+00> : vector<64x32xf32>
    %78 = tpu.matmul %77, %69, %cst_63 {dimension_numbers = #tpu.dot_dimension_numbers<[1], [0], [0], [1], [0, 0, 1, 1], [], []>} : vector<64x128xbf16>, vector<128x32xbf16>, vector<64x32xf32> -> vector<64x32xf32>
    %79 = vector.broadcast %71 : vector<1x32xf32> to vector<64x32xf32>
    %80 = arith.addf %78, %79 : vector<64x32xf32>
    %cst_64 = arith.constant 0.000000e+00 : f32
    %81 = vector.broadcast %cst_64 : f32 to vector<64x32xf32>
    %82 = arith.maximumf %80, %81 : vector<64x32xf32>
    %83 = arith.truncf %82 : vector<64x32xf32> to vector<64x32xbf16>
    %cst_65 = arith.constant dense<0.000000e+00> : vector<64x128xf32>
    %84 = tpu.matmul %83, %73, %cst_65 {dimension_numbers = #tpu.dot_dimension_numbers<[1], [0], [0], [1], [0, 0, 1, 1], [], []>} : vector<64x32xbf16>, vector<32x128xbf16>, vector<64x128xf32> -> vector<64x128xf32>
    %85 = vector.broadcast %75 : vector<1x128xf32> to vector<64x128xf32>
    %86 = arith.addf %84, %85 : vector<64x128xf32>
    %cst_66 = arith.constant 0.000000e+00 : f32
    %87 = vector.broadcast %cst_66 : f32 to vector<64x128xf32>
    %88 = arith.maximumf %86, %87 : vector<64x128xf32>
    %c0_67 = arith.constant 0 : index
    %c0_68 = arith.constant 0 : index
    %89 = vector.load %arg6[%c0_67, %c0_68] : memref<64x128xf32, #tpu.memory_space<vmem>>, vector<64x128xf32>
    tpu.vector_store %arg6[%c0_67, %c0_68], %88 {strides = array<i32>} : memref<64x128xf32, #tpu.memory_space<vmem>>, vector<64x128xf32>,
    return
  }
}

</mosaic_0001>

<bundles_post_ra>
// kernel: gnn_forward.1
= control target key start
LH: loop header
LB: loop body
LE: loop exit
PB: predicated region body
PF: predicated region fallthrough
CT: control target
= control target key end

     0   :  { %vm106_vm0 = vcmask 523264   ;;  %vm337_vm1 = vcmask 261120   ;;  %s2231_s1 = inlined_call_operand.vmem [shape: bf16[64,128], index: 1, kind: input, shape index: {}]   ;;  %s2232_s0 = inlined_call_operand.vmem [shape: bf16[64,64], index: 0, kind: input, shape index: {}]   ;;  %s2233_s2 = inlined_call_operand.vmem [shape: bf16[4,128,32], index: 2, kind: input, shape index: {}]   ;;  %s2234_s4 = inlined_call_operand.vmem [shape: bf16[4,32,128], index: 4, kind: input, shape index: {}]   ;;  %s2235_s3 = inlined_call_operand.vmem [shape: f32[4,1,32], index: 3, kind: input, shape index: {}]   ;;  %s2236_s5 = inlined_call_operand.vmem [shape: f32[4,1,128], index: 5, kind: input, shape index: {}]   ;;  %s2237_s6 = inlined_call_operand.vmem [shape: f32[64,128], index: 6, kind: output, shape index: {}]  }
   0x1   :  { %v1900_v0 = vld [vmem:[%s2231_s1] sm:$0xff]   ;;  %v1901_v1 = vld [vmem:[%s2231_s1 + $0x8] sm:$0xff]   ;;  %v1902_v2 = vld [vmem:[%s2231_s1 + $0x10] sm:$0xff]  }
   0x2   :  { %1692 = vmatprep.subr.bf16.mxu0 %v1900_v0  ;;  %v1995_v3 = vld [vmem:[%s2232_s0] sm:$0xff]   ;;  %v1903_v4 = vld [vmem:[%s2231_s1 + $0x18] sm:$0xff]   ;;  %v1909_v6 = vld [vmem:[%s2233_s2 + $0x8] sm:$0xff]  }
   0x3   :  { %1693 = vmatpush3.bf16.msra.mxu0 %v1900_v0  ;;  %1700 = vmatprep.mubr.msk.bf16.mxu0 %vm106_vm0, %v1995_v3  ;;  %v1908_v5 = vld [vmem:[%s2233_s2] sm:$0xff]   ;;  %v2011_v7 = vld [vmem:[%s2232_s0 + $0x8] sm:$0xff]   ;;  %v1910_v8 = vld [vmem:[%s2233_s2 + $0x10] sm:$0xff]  }
   0x4   :  { %1694 = vmatprep.subr.bf16.mxu0 %v1901_v1  ;;  %1708 = vmatprep.subr.bf16.mxu1 %v1908_v5  ;;  %v2019_v9 = vld [vmem:[%s2232_s0 + $0x10] sm:$0xff]   ;;  %v1911_v10 = vld [vmem:[%s2233_s2 + $0x18] sm:$0xff]   ;;  %v1912_v11 = vld [vmem:[%s2233_s2 + $0x20] sm:$0xff]  }
   0x5   :  { %1709 = vmatpush3.bf16.msra.mxu1 %v1908_v5  ;;  %v2034_v12 = vld [vmem:[%s2232_s0 + $0x18] sm:$0xff]   ;;  %v1913_v13 = vld [vmem:[%s2233_s2 + $0x28] sm:$0xff]   ;;  %v1914_v14 = vld [vmem:[%s2233_s2 + $0x30] sm:$0xff]  }
   0x6   :  { %1710 = vmatprep.subr.bf16.mxu1 %v1909_v6  ;;  %v1915_v15 = vld [vmem:[%s2233_s2 + $0x38] sm:$0xff]   ;;  %v1916_v16 = vld [vmem:[%s2234_s4] sm:$0xff]   ;;  %v1917_v29 = vld [vmem:[%s2234_s4 + $0x8] sm:$0xff]  }
   0x7   :  { %1695 = vmatpush3.bf16.msra.mxu0 %v1901_v1  ;;  %v1446_v30 = vld [vmem:[%s2235_s3] ss:$0 sm:$0xff]  ;;  %v1919_v60 = vld [vmem:[%s2233_s2 + $0x48] sm:$0xff]   ;;  %v1920_v61 = vld [vmem:[%s2233_s2 + $0x50] sm:$0xff]  }
   0x8   :  { %1696 = vmatprep.subr.bf16.mxu0 %v1902_v2  ;;  %v1918_v59 = vld [vmem:[%s2233_s2 + $0x40] sm:$0xff]   ;;  %v1921_v62 = vld [vmem:[%s2233_s2 + $0x58] sm:$0xff]   ;;  %v1923_v0 = vld [vmem:[%s2233_s2 + $0x68] sm:$0xff]  }
   0x9   :  { %1711 = vmatpush3.bf16.msra.mxu1 %v1909_v6  ;;  %v1922_v63 = vld [vmem:[%s2233_s2 + $0x60] sm:$0xff]   ;;  %v1924_v1 = vld [vmem:[%s2233_s2 + $0x70] sm:$0xff]  }
   0xa   :  { %1712 = vmatprep.subr.bf16.mxu1 %v1910_v8 }
   0xb   :  { %1697 = vmatpush3.bf16.msra.mxu0 %v1902_v2  ;;  %v1455_v2 = vld [vmem:[%s2236_s5] ss:$0 sm:$0xff] }
   0xc   :  { %1698 = vmatprep.subr.bf16.mxu0 %v1903_v4 }
   0xd   :  { %1713 = vmatpush3.bf16.msra.mxu1 %v1910_v8 }
   0xe   :  { %1714 = vmatprep.subr.bf16.mxu1 %v1911_v10 }
   0xf   :  { %1699 = vmatpush3.bf16.msra.mxu0 %v1903_v4 }
  0x10   :  { %1732 = vmatprep.subr.bf16.mxu0 %v1916_v16 }
  0x11   :  { %1715 = vmatpush3.bf16.msra.mxu1 %v1911_v10 }
  0x12   :  { %1701 = vmatmul.mubr.msk.bf16.vlgmr.msra.gmra.mrb[0].mxu0 %vm106_vm0, %v2011_v7  ;;  %1716 = vmatprep.subr.bf16.mxu1 %v1912_v11 }
  0x13   :  { %1704 = vmatprep.mubr.msk.bf16.mxu0 %vm106_vm0, %v2019_v9  ;;  %1733 = vmatpush3.bf16.msra.mxu0 %v1916_v16 }
  0x14   :  { %1734 = vmatprep.subr.bf16.mxu0 %v1917_v29 }
  0x15   :  { %1717 = vmatpush3.bf16.msra.mxu1 %v1912_v11 }
  0x16   :  { %1718 = vmatprep.subr.bf16.mxu1 %v1913_v13 }
  0x17   :  { %1735 = vmatpush3.bf16.msra.mxu0 %v1917_v29 }
  0x19   :  { %1719 = vmatpush3.bf16.msra.mxu1 %v1913_v13 }
  0x1a   :  { %1705 = vmatmul.mubr.msk.bf16.gmra.mrb[4].mxu0 %vm106_vm0, %v2034_v12  ;;  %1720 = vmatprep.subr.bf16.mxu1 %v1914_v14 }
  0x1d   :  { %1721 = vmatpush3.bf16.msra.mxu1 %v1914_v14 }
  0x1e   :  { %1722 = vmatprep.subr.bf16.mxu1 %v1915_v15 }
  0x21   :  { %1723 = vmatpush3.bf16.msra.mxu1 %v1915_v15 }
  0x22   :  { %1760 = vmatprep.subr.bf16.mxu1 %v1918_v59 }
  0xe5   :  { %v1702_v17 = vpop.f32.mrb[0].mxu0 }
  0xe6   :  { %v153_v18 = vpop.f32.mrb[1].mxu0 }
  0xe7   :  { %v1703_v19 = vpop.f32.mrb[2].mxu0 }
  0xe8   :  { %v185_v20 = vpack.c.bf16 %v1703_v19, %v1702_v17  ;;  %v156_v21 = vpop.f32.mrb[3].mxu0 }
  0xe9   :  { %v184_v22 = vpack.c.bf16 %v156_v21, %v153_v18 }
  0xeb   :  { %1724 = vmatprep.mubr.bf16.mxu1 %v184_v22 }
  0xec   :  { %1725 = vmatmul.mubr.bf16.vlgmr.msra.gmra.mrb[0].mxu1 %v185_v20 }
  0xed   :  { %v1706_v23 = vpop.f32.mrb[4].mxu0  ;;  %1761 = vmatpush3.bf16.msra.mxu1 %v1918_v59 }
  0xee   :  { %v169_v24 = vpop.f32.mrb[5].mxu0  ;;  %1762 = vmatprep.subr.bf16.mxu1 %v1919_v60 }
  0xef   :  { %v1707_v25 = vpop.f32.mrb[6].mxu0 }
  0xf0   :  { %v187_v26 = vpack.c.bf16 %v1707_v25, %v1706_v23  ;;  %v172_v27 = vpop.f32.mrb[7].mxu0 }
  0xf1   :  { %v186_v28 = vpack.c.bf16 %v172_v27, %v169_v24  ;;  %1763 = vmatpush3.bf16.msra.mxu1 %v1919_v60 }
  0xf2   :  { %1764 = vmatprep.subr.bf16.mxu1 %v1920_v61 }
  0xf3   :  { %1728 = vmatprep.mubr.bf16.mxu1 %v186_v28 }
  0xf4   :  { %1729 = vmatmul.mubr.bf16.gmra.mrb[4].mxu1 %v187_v26 }
  0xf5   :  { %1765 = vmatpush3.bf16.msra.mxu1 %v1920_v61 }
  0xf6   :  { %1766 = vmatprep.subr.bf16.mxu1 %v1921_v62 }
  0xf9   :  { %1767 = vmatpush3.bf16.msra.mxu1 %v1921_v62 }
  0xfa   :  { %1768 = vmatprep.subr.bf16.mxu1 %v1922_v63 }
  0xfd   :  { %1769 = vmatpush3.bf16.msra.mxu1 %v1922_v63 }
  0xfe   :  { %1770 = vmatprep.subr.bf16.mxu1 %v1923_v0 }
 0x101   :  { %1771 = vmatpush3.bf16.msra.mxu1 %v1923_v0 }
 0x102   :  { %1772 = vmatprep.subr.bf16.mxu1 %v1924_v1 }
 0x105   :  { %1773 = vmatpush3.bf16.msra.mxu1 %v1924_v1 }
 0x1bf   :  { %v1726_v31 = vpop.f32.mrb[0].mxu1 }
 0x1c0   :  { %v285_v32 = vadd.f32 %v1726_v31, %v1446_v30  ;;  %v276_v33 = vpop.f32.mrb[1].mxu1 }
 0x1c1   :  { %v277_v34 = vadd.f32 %v1446_v30, %v276_v33  ;;  %v1727_v35 = vpop.f32.mrb[2].mxu1 }
 0x1c2   :  { %v288_v36 = vadd.f32 %v1727_v35, %v1446_v30  ;;  %v279_v37 = vpop.f32.mrb[3].mxu1  ;;  %v309_v39 = vmax.f32 %v285_v32, 0.0  ;;  %v1925_v35 = vld [vmem:[%s2233_s2 + $0x78] sm:$0xff]  }
 0x1c3   :  { %v280_v38 = vadd.f32 %v1446_v30, %v279_v37  ;;  %v307_v41 = vmax.f32 %v277_v34, 0.0  ;;  %1774 = vmatprep.subr.bf16.mxu1 %v1925_v35 }
 0x1c4   :  { %v310_v40 = vmax.f32 %v288_v36, 0.0  ;;  %1775 = vmatpush3.bf16.msra.mxu1 %v1925_v35  ;;  %v1926_v36 = vld [vmem:[%s2234_s4 + $0x10] sm:$0xff]  }
 0x1c5   :  { %v308_v42 = vmax.f32 %v280_v38, 0.0 }
 0x1c6   :  { %v316_v43 = vpack.c.bf16 %v310_v40, %v309_v39 }
 0x1c7   :  { %v315_v44 = vpack.c.bf16 %v308_v42, %v307_v41  ;;  %v1730_v45 = vpop.f32.mrb[4].mxu1 }
 0x1c8   :  { %v301_v46 = vadd.f32 %v1730_v45, %v1446_v30  ;;  %v292_v47 = vpop.f32.mrb[5].mxu1 }
 0x1c9   :  { %v293_v48 = vadd.f32 %v1446_v30, %v292_v47  ;;  %v1731_v49 = vpop.f32.mrb[6].mxu1  ;;  %1736 = vmatprep.mubr.msk.bf16.mxu0 %vm337_vm1, %v315_v44 }
 0x1ca   :  { %v304_v50 = vadd.f32 %v1731_v49, %v1446_v30  ;;  %v295_v51 = vpop.f32.mrb[7].mxu1  ;;  %1737 = vmatmul.mubr.msk.bf16.vlgmr.msra.gmra.mrb[8].mxu0 %vm337_vm1, %v316_v43  ;;  %v313_v53 = vmax.f32 %v301_v46, 0.0  ;;  %v1927_v49 = vld [vmem:[%s2234_s4 + $0x18] sm:$0xff]  }
 0x1cb   :  { %v296_v52 = vadd.f32 %v1446_v30, %v295_v51  ;;  %v311_v55 = vmax.f32 %v293_v48, 0.0 }
 0x1cc   :  { %v314_v54 = vmax.f32 %v304_v50, 0.0  ;;  %v1488_v50 = vld [vmem:[%s2235_s3 + $0x1] ss:$0 sm:$0xff] }
 0x1cd   :  { %v312_v56 = vmax.f32 %v296_v52, 0.0 }
 0x1ce   :  { %v318_v57 = vpack.c.bf16 %v314_v54, %v313_v53 }
 0x1cf   :  { %v317_v58 = vpack.c.bf16 %v312_v56, %v311_v55 }
 0x1d1   :  { %1740 = vmatprep.mubr.msk.bf16.mxu0 %vm337_vm1, %v317_v58 }
 0x1d2   :  { %1741 = vmatmul.mubr.msk.bf16.gmra.mrb[12].mxu0 %vm337_vm1, %v318_v57 }
 0x1d3   :  { %1752 = vmatprep.mubr.msk.bf16.mxu0 %vm106_vm0, %v1995_v3 }
 0x29d   :  { %v1738_v4 = vpop.f32.mrb[8].mxu0 }
 0x29e   :  { %v393_v5 = vadd.f32 %v1738_v4, %v1455_v2  ;;  %v384_v6 = vpop.f32.mrb[9].mxu0 }
 0x29f   :  { %v385_v8 = vadd.f32 %v1455_v2, %v384_v6  ;;  %v1739_v10 = vpop.f32.mrb[10].mxu0 }
 0x2a0   :  { %v396_v11 = vadd.f32 %v1739_v10, %v1455_v2  ;;  %v387_v13 = vpop.f32.mrb[11].mxu0  ;;  %v417_v15 = vmax.f32 %v393_v5, 0.0 }
 0x2a1   :  { %v388_v14 = vadd.f32 %v1455_v2, %v387_v13  ;;  %v415_v17 = vmax.f32 %v385_v8, 0.0 }
 0x2a2   :  { %v418_v16 = vmax.f32 %v396_v11, 0.0 }
 0x2a3   :  { %v416_v18 = vmax.f32 %v388_v14, 0.0 }
 0x2a4   :  { %v424_v19 = vpack.c.bf16 %v418_v16, %v417_v15 }
 0x2a5   :  { %v423_v20 = vpack.c.bf16 %v416_v18, %v415_v17  ;;  %v1742_v21 = vpop.f32.mrb[12].mxu0 }
 0x2a6   :  { %v409_v22 = vadd.f32 %v1742_v21, %v1455_v2  ;;  %v400_v23 = vpop.f32.mrb[13].mxu0  ;;  %v1930_v21 = vld [vmem:[%s2233_s2 + $0x90] sm:$0xff]  }
 0x2a7   :  { %v401_v24 = vadd.f32 %v1455_v2, %v400_v23  ;;  %v1743_v25 = vpop.f32.mrb[14].mxu0  ;;  %1744 = vmatprep.subr.bf16.mxu0 %v423_v20  ;;  %v1932_v23 = vld [vmem:[%s2233_s2 + $0xa0] sm:$0xff]  }
 0x2a8   :  { %v412_v26 = vadd.f32 %v1743_v25, %v1455_v2  ;;  %v403_v27 = vpop.f32.mrb[15].mxu0  ;;  %1745 = vmatpush3.bf16.msra.mxu0 %v423_v20  ;;  %v421_v29 = vmax.f32 %v409_v22, 0.0  ;;  %v1929_v20 = vld [vmem:[%s2233_s2 + $0x88] sm:$0xff]   ;;  %v1931_v22 = vld [vmem:[%s2233_s2 + $0x98] sm:$0xff]   ;;  %v1934_v25 = vld [vmem:[%s2233_s2 + $0xb0] sm:$0xff]  }
 0x2a9   :  { %v404_v28 = vadd.f32 %v1455_v2, %v403_v27  ;;  %1746 = vmatprep.subr.bf16.mxu0 %v424_v19  ;;  %v419_v31 = vmax.f32 %v401_v24, 0.0  ;;  %v1933_v24 = vld [vmem:[%s2233_s2 + $0xa8] sm:$0xff]  }
 0x2aa   :  { %v422_v30 = vmax.f32 %v412_v26, 0.0  ;;  %v1497_v26 = vld [vmem:[%s2236_s5 + $0x1] ss:$0 sm:$0xff] }
 0x2ab   :  { %v420_v32 = vmax.f32 %v404_v28, 0.0 }
 0x2ac   :  { %v426_v33 = vpack.c.bf16 %v422_v30, %v421_v29  ;;  %1747 = vmatpush3.bf16.msra.mxu0 %v424_v19  ;;  %v1928_v19 = vld [vmem:[%s2233_s2 + $0x80] sm:$0xff]  }
 0x2ad   :  { %v425_v34 = vpack.c.bf16 %v420_v32, %v419_v31  ;;  %1812 = vmatprep.subr.bf16.mxu1 %v1928_v19 }
 0x2af   :  { %1748 = vmatprep.subr.bf16.mxu0 %v425_v34 }
 0x2b0   :  { %1749 = vmatpush3.bf16.msra.mxu0 %v425_v34 }
 0x2b1   :  { %1750 = vmatprep.subr.bf16.mxu0 %v426_v33 }
 0x2b4   :  { %1751 = vmatpush3.bf16.msra.mxu0 %v426_v33 }
 0x2b5   :  { %1784 = vmatprep.subr.bf16.mxu0 %v1926_v36 }
 0x2b7   :  { %1753 = vmatmul.mubr.msk.bf16.vlgmr.msra.gmra.mrb[16].mxu0 %vm106_vm0, %v2011_v7 }
 0x2b8   :  { %1756 = vmatprep.mubr.msk.bf16.mxu0 %vm106_vm0, %v2019_v9  ;;  %1785 = vmatpush3.bf16.msra.mxu0 %v1926_v36 }
 0x2b9   :  { %1786 = vmatprep.subr.bf16.mxu0 %v1927_v49 }
 0x2bc   :  { %1787 = vmatpush3.bf16.msra.mxu0 %v1927_v49 }
 0x2bf   :  { %1757 = vmatmul.mubr.msk.bf16.gmra.mrb[20].mxu0 %vm106_vm0, %v2034_v12 }
 0x38a   :  { %v1754_v37 = vpop.f32.mrb[16].mxu0 }
 0x38b   :  { %v487_v38 = vpop.f32.mrb[17].mxu0 }
 0x38c   :  { %v1755_v39 = vpop.f32.mrb[18].mxu0 }
 0x38d   :  { %v519_v40 = vpack.c.bf16 %v1755_v39, %v1754_v37  ;;  %v490_v41 = vpop.f32.mrb[19].mxu0 }
 0x38e   :  { %v518_v42 = vpack.c.bf16 %v490_v41, %v487_v38 }
 0x390   :  { %1776 = vmatprep.mubr.bf16.mxu1 %v518_v42 }
 0x391   :  { %1777 = vmatmul.mubr.bf16.vlgmr.msra.gmra.mrb[8].mxu1 %v519_v40 }
 0x392   :  { %v1758_v43 = vpop.f32.mrb[20].mxu0  ;;  %1813 = vmatpush3.bf16.msra.mxu1 %v1928_v19 }
 0x393   :  { %v503_v44 = vpop.f32.mrb[21].mxu0  ;;  %1814 = vmatprep.subr.bf16.mxu1 %v1929_v20 }
 0x394   :  { %v1759_v45 = vpop.f32.mrb[22].mxu0 }
 0x395   :  { %v521_v46 = vpack.c.bf16 %v1759_v45, %v1758_v43  ;;  %v506_v47 = vpop.f32.mrb[23].mxu0 }
 0x396   :  { %v520_v48 = vpack.c.bf16 %v506_v47, %v503_v44  ;;  %1815 = vmatpush3.bf16.msra.mxu1 %v1929_v20 }
 0x397   :  { %1816 = vmatprep.subr.bf16.mxu1 %v1930_v21 }
 0x398   :  { %1780 = vmatprep.mubr.bf16.mxu1 %v520_v48 }
 0x399   :  { %1781 = vmatmul.mubr.bf16.gmra.mrb[12].mxu1 %v521_v46 }
 0x39a   :  { %1817 = vmatpush3.bf16.msra.mxu1 %v1930_v21 }
 0x39b   :  { %1818 = vmatprep.subr.bf16.mxu1 %v1931_v22 }
 0x39e   :  { %1819 = vmatpush3.bf16.msra.mxu1 %v1931_v22 }
 0x39f   :  { %1820 = vmatprep.subr.bf16.mxu1 %v1932_v23 }
 0x3a2   :  { %1821 = vmatpush3.bf16.msra.mxu1 %v1932_v23 }
 0x3a3   :  { %1822 = vmatprep.subr.bf16.mxu1 %v1933_v24 }
 0x3a6   :  { %1823 = vmatpush3.bf16.msra.mxu1 %v1933_v24 }
 0x3a7   :  { %1824 = vmatprep.subr.bf16.mxu1 %v1934_v25 }
 0x3aa   :  { %1825 = vmatpush3.bf16.msra.mxu1 %v1934_v25 }
 0x464   :  { %v1778_v51 = vpop.f32.mrb[8].mxu1 }
 0x465   :  { %v619_v52 = vadd.f32 %v1778_v51, %v1488_v50  ;;  %v610_v53 = vpop.f32.mrb[9].mxu1 }
 0x466   :  { %v611_v54 = vadd.f32 %v1488_v50, %v610_v53  ;;  %v1779_v55 = vpop.f32.mrb[10].mxu1 }
 0x467   :  { %v622_v56 = vadd.f32 %v1779_v55, %v1488_v50  ;;  %v613_v57 = vpop.f32.mrb[11].mxu1  ;;  %v643_v59 = vmax.f32 %v619_v52, 0.0  ;;  %v1935_v55 = vld [vmem:[%s2233_s2 + $0xb8] sm:$0xff]  }
 0x468   :  { %v614_v58 = vadd.f32 %v1488_v50, %v613_v57  ;;  %v641_v61 = vmax.f32 %v611_v54, 0.0  ;;  %1826 = vmatprep.subr.bf16.mxu1 %v1935_v55 }
 0x469   :  { %v644_v60 = vmax.f32 %v622_v56, 0.0  ;;  %1827 = vmatpush3.bf16.msra.mxu1 %v1935_v55  ;;  %v1936_v56 = vld [vmem:[%s2234_s4 + $0x20] sm:$0xff]  }
 0x46a   :  { %v642_v62 = vmax.f32 %v614_v58, 0.0 }
 0x46b   :  { %v650_v63 = vpack.c.bf16 %v644_v60, %v643_v59 }
 0x46c   :  { %v649_v0 = vpack.c.bf16 %v642_v62, %v641_v61  ;;  %v1782_v1 = vpop.f32.mrb[12].mxu1 }
 0x46d   :  { %v635_v2 = vadd.f32 %v1782_v1, %v1488_v50  ;;  %v626_v4 = vpop.f32.mrb[13].mxu1 }
 0x46e   :  { %v627_v5 = vadd.f32 %v1488_v50, %v626_v4  ;;  %v1783_v6 = vpop.f32.mrb[14].mxu1  ;;  %1788 = vmatprep.mubr.msk.bf16.mxu0 %vm337_vm1, %v649_v0 }
 0x46f   :  { %v638_v8 = vadd.f32 %v1783_v6, %v1488_v50  ;;  %v629_v10 = vpop.f32.mrb[15].mxu1  ;;  %1789 = vmatmul.mubr.msk.bf16.vlgmr.msra.gmra.mrb[24].mxu0 %vm337_vm1, %v650_v63  ;;  %v647_v13 = vmax.f32 %v635_v2, 0.0  ;;  %v1937_v6 = vld [vmem:[%s2234_s4 + $0x28] sm:$0xff]  }
 0x470   :  { %v630_v11 = vadd.f32 %v1488_v50, %v629_v10  ;;  %v645_v15 = vmax.f32 %v627_v5, 0.0 }
 0x471   :  { %v648_v14 = vmax.f32 %v638_v8, 0.0  ;;  %v1530_v8 = vld [vmem:[%s2235_s3 + $0x2] ss:$0 sm:$0xff] }
 0x472   :  { %v646_v16 = vmax.f32 %v630_v11, 0.0 }
 0x473   :  { %v652_v17 = vpack.c.bf16 %v648_v14, %v647_v13 }
 0x474   :  { %v651_v18 = vpack.c.bf16 %v646_v16, %v645_v15 }
 0x476   :  { %1792 = vmatprep.mubr.msk.bf16.mxu0 %vm337_vm1, %v651_v18 }
 0x477   :  { %1793 = vmatmul.mubr.msk.bf16.gmra.mrb[28].mxu0 %vm337_vm1, %v652_v17 }
 0x478   :  { %1804 = vmatprep.mubr.msk.bf16.mxu0 %vm106_vm0, %v1995_v3 }
 0x542   :  { %v1790_v27 = vpop.f32.mrb[24].mxu0 }
 0x543   :  { %v726_v28 = vadd.f32 %v1790_v27, %v1497_v26  ;;  %v717_v29 = vpop.f32.mrb[25].mxu0 }
 0x544   :  { %v718_v30 = vadd.f32 %v1497_v26, %v717_v29  ;;  %v1791_v31 = vpop.f32.mrb[26].mxu0 }
 0x545   :  { %v729_v32 = vadd.f32 %v1791_v31, %v1497_v26  ;;  %v720_v33 = vpop.f32.mrb[27].mxu0  ;;  %v750_v35 = vmax.f32 %v726_v28, 0.0 }
 0x546   :  { %v721_v34 = vadd.f32 %v1497_v26, %v720_v33  ;;  %v748_v37 = vmax.f32 %v718_v30, 0.0 }
 0x547   :  { %v751_v36 = vmax.f32 %v729_v32, 0.0 }
 0x548   :  { %v749_v38 = vmax.f32 %v721_v34, 0.0 }
 0x549   :  { %v757_v39 = vpack.c.bf16 %v751_v36, %v750_v35 }
 0x54a   :  { %v756_v40 = vpack.c.bf16 %v749_v38, %v748_v37  ;;  %v1794_v41 = vpop.f32.mrb[28].mxu0 }
 0x54b   :  { %v742_v42 = vadd.f32 %v1794_v41, %v1497_v26  ;;  %v733_v43 = vpop.f32.mrb[29].mxu0  ;;  %v1940_v41 = vld [vmem:[%s2233_s2 + $0xd0] sm:$0xff]  }
 0x54c   :  { %v734_v44 = vadd.f32 %v1497_v26, %v733_v43  ;;  %v1795_v45 = vpop.f32.mrb[30].mxu0  ;;  %1796 = vmatprep.subr.bf16.mxu0 %v756_v40  ;;  %v1943_v43 = vld [vmem:[%s2233_s2 + $0xe8] sm:$0xff]  }
 0x54d   :  { %v745_v46 = vadd.f32 %v1795_v45, %v1497_v26  ;;  %v736_v47 = vpop.f32.mrb[31].mxu0  ;;  %1797 = vmatpush3.bf16.msra.mxu0 %v756_v40  ;;  %v754_v49 = vmax.f32 %v742_v42, 0.0  ;;  %v1939_v40 = vld [vmem:[%s2233_s2 + $0xc8] sm:$0xff]   ;;  %v1942_v42 = vld [vmem:[%s2233_s2 + $0xe0] sm:$0xff]  }
 0x54e   :  { %v737_v48 = vadd.f32 %v1497_v26, %v736_v47  ;;  %1798 = vmatprep.subr.bf16.mxu0 %v757_v39  ;;  %v752_v51 = vmax.f32 %v734_v44, 0.0  ;;  %v1944_v44 = vld [vmem:[%s2233_s2 + $0xf0] sm:$0xff]   ;;  %v1539_v45 = vld [vmem:[%s2236_s5 + $0x2] ss:$0 sm:$0xff] }
 0x54f   :  { %v755_v50 = vmax.f32 %v745_v46, 0.0 }
 0x550   :  { %v753_v52 = vmax.f32 %v737_v48, 0.0 }
 0x551   :  { %v759_v53 = vpack.c.bf16 %v755_v50, %v754_v49  ;;  %1799 = vmatpush3.bf16.msra.mxu0 %v757_v39  ;;  %v1938_v39 = vld [vmem:[%s2233_s2 + $0xc0] sm:$0xff]  }
 0x552   :  { %v758_v54 = vpack.c.bf16 %v753_v52, %v752_v51  ;;  %1864 = vmatprep.subr.bf16.mxu1 %v1938_v39 }
 0x554   :  { %1800 = vmatprep.subr.bf16.mxu0 %v758_v54 }
 0x555   :  { %1801 = vmatpush3.bf16.msra.mxu0 %v758_v54 }
 0x556   :  { %1802 = vmatprep.subr.bf16.mxu0 %v759_v53 }
 0x559   :  { %1803 = vmatpush3.bf16.msra.mxu0 %v759_v53 }
 0x55a   :  { %1836 = vmatprep.subr.bf16.mxu0 %v1936_v56 }
 0x55c   :  { %1805 = vmatmul.mubr.msk.bf16.vlgmr.msra.gmra.mrb[32].mxu0 %vm106_vm0, %v2011_v7 }
 0x55d   :  { %1808 = vmatprep.mubr.msk.bf16.mxu0 %vm106_vm0, %v2019_v9  ;;  %1837 = vmatpush3.bf16.msra.mxu0 %v1936_v56 }
 0x55e   :  { %1838 = vmatprep.subr.bf16.mxu0 %v1937_v6 }
 0x561   :  { %1839 = vmatpush3.bf16.msra.mxu0 %v1937_v6 }
 0x564   :  { %1809 = vmatmul.mubr.msk.bf16.gmra.mrb[36].mxu0 %vm106_vm0, %v2034_v12 }
 0x62f   :  { %v1806_v57 = vpop.f32.mrb[32].mxu0 }
 0x630   :  { %v820_v58 = vpop.f32.mrb[33].mxu0 }
 0x631   :  { %v1807_v59 = vpop.f32.mrb[34].mxu0 }
 0x632   :  { %v852_v60 = vpack.c.bf16 %v1807_v59, %v1806_v57  ;;  %v823_v61 = vpop.f32.mrb[35].mxu0 }
 0x633   :  { %v851_v62 = vpack.c.bf16 %v823_v61, %v820_v58 }
 0x635   :  { %1828 = vmatprep.mubr.bf16.mxu1 %v851_v62 }
 0x636   :  { %1829 = vmatmul.mubr.bf16.vlgmr.msra.gmra.mrb[16].mxu1 %v852_v60 }
 0x637   :  { %v1810_v63 = vpop.f32.mrb[36].mxu0  ;;  %1865 = vmatpush3.bf16.msra.mxu1 %v1938_v39 }
 0x638   :  { %v836_v0 = vpop.f32.mrb[37].mxu0  ;;  %1866 = vmatprep.subr.bf16.mxu1 %v1939_v40 }
 0x639   :  { %v1811_v1 = vpop.f32.mrb[38].mxu0 }
 0x63a   :  { %v854_v2 = vpack.c.bf16 %v1811_v1, %v1810_v63  ;;  %v839_v4 = vpop.f32.mrb[39].mxu0 }
 0x63b   :  { %v853_v5 = vpack.c.bf16 %v839_v4, %v836_v0  ;;  %1867 = vmatpush3.bf16.msra.mxu1 %v1939_v40 }
 0x63c   :  { %1868 = vmatprep.subr.bf16.mxu1 %v1940_v41 }
 0x63d   :  { %1832 = vmatprep.mubr.bf16.mxu1 %v853_v5 }
 0x63e   :  { %1833 = vmatmul.mubr.bf16.gmra.mrb[20].mxu1 %v854_v2 }
 0x63f   :  { %1869 = vmatpush3.bf16.msra.mxu1 %v1940_v41 }
 0x709   :  { %v1830_v10 = vpop.f32.mrb[16].mxu1 }
 0x70a   :  { %v952_v11 = vadd.f32 %v1830_v10, %v1530_v8  ;;  %v943_v13 = vpop.f32.mrb[17].mxu1 }
 0x70b   :  { %v944_v14 = vadd.f32 %v1530_v8, %v943_v13  ;;  %v1831_v15 = vpop.f32.mrb[18].mxu1 }
 0x70c   :  { %v955_v16 = vadd.f32 %v1831_v15, %v1530_v8  ;;  %v946_v17 = vpop.f32.mrb[19].mxu1  ;;  %v976_v19 = vmax.f32 %v952_v11, 0.0  ;;  %v1946_v15 = vld [vmem:[%s2234_s4 + $0x30] sm:$0xff]  }
 0x70d   :  { %v947_v18 = vadd.f32 %v1530_v8, %v946_v17  ;;  %v974_v21 = vmax.f32 %v944_v14, 0.0  ;;  %v1945_v14 = vld [vmem:[%s2233_s2 + $0xf8] sm:$0xff]  }
 0x70e   :  { %v977_v20 = vmax.f32 %v955_v16, 0.0 }
 0x70f   :  { %v975_v22 = vmax.f32 %v947_v18, 0.0 }
 0x710   :  { %v983_v23 = vpack.c.bf16 %v977_v20, %v976_v19 }
 0x711   :  { %v982_v24 = vpack.c.bf16 %v975_v22, %v974_v21  ;;  %v1834_v25 = vpop.f32.mrb[20].mxu1 }
 0x712   :  { %v968_v26 = vadd.f32 %v1834_v25, %v1530_v8  ;;  %v959_v27 = vpop.f32.mrb[21].mxu1  ;;  %v1947_v25 = vld [vmem:[%s2234_s4 + $0x38] sm:$0xff]  }
 0x713   :  { %v960_v28 = vadd.f32 %v1530_v8, %v959_v27  ;;  %v1835_v29 = vpop.f32.mrb[22].mxu1  ;;  %1840 = vmatprep.mubr.msk.bf16.mxu0 %vm337_vm1, %v982_v24 }
 0x714   :  { %v971_v30 = vadd.f32 %v1835_v29, %v1530_v8  ;;  %v962_v31 = vpop.f32.mrb[23].mxu1  ;;  %1841 = vmatmul.mubr.msk.bf16.vlgmr.msra.gmra.mrb[40].mxu0 %vm337_vm1, %v983_v23  ;;  %v980_v33 = vmax.f32 %v968_v26, 0.0  ;;  %v1572_v26 = vld [vmem:[%s2235_s3 + $0x3] ss:$0 sm:$0xff] }
 0x715   :  { %v963_v32 = vadd.f32 %v1530_v8, %v962_v31  ;;  %v978_v35 = vmax.f32 %v960_v28, 0.0 }
 0x716   :  { %v981_v34 = vmax.f32 %v971_v30, 0.0 }
 0x717   :  { %v979_v36 = vmax.f32 %v963_v32, 0.0 }
 0x718   :  { %v985_v37 = vpack.c.bf16 %v981_v34, %v980_v33 }
 0x719   :  { %v984_v38 = vpack.c.bf16 %v979_v36, %v978_v35 }
 0x71b   :  { %1844 = vmatprep.mubr.msk.bf16.mxu0 %vm337_vm1, %v984_v38 }
 0x71c   :  { %1845 = vmatmul.mubr.msk.bf16.gmra.mrb[44].mxu0 %vm337_vm1, %v985_v37 }
 0x71d   :  { %1856 = vmatprep.mubr.msk.bf16.mxu0 %vm106_vm0, %v1995_v3  ;;  %v1941_v3 = vld [vmem:[%s2233_s2 + $0xd8] sm:$0xff]  }
 0x71e   :  { %1870 = vmatprep.subr.bf16.mxu1 %v1941_v3 }
 0x71f   :  { %1871 = vmatpush3.bf16.msra.mxu1 %v1941_v3 }
 0x720   :  { %1872 = vmatprep.subr.bf16.mxu1 %v1942_v42 }
 0x723   :  { %1873 = vmatpush3.bf16.msra.mxu1 %v1942_v42 }
 0x724   :  { %1874 = vmatprep.subr.bf16.mxu1 %v1943_v43 }
 0x727   :  { %1875 = vmatpush3.bf16.msra.mxu1 %v1943_v43 }
 0x728   :  { %1876 = vmatprep.subr.bf16.mxu1 %v1944_v44 }
 0x72b   :  { %1877 = vmatpush3.bf16.msra.mxu1 %v1944_v44 }
 0x72c   :  { %1878 = vmatprep.subr.bf16.mxu1 %v1945_v14 }
 0x72f   :  { %1879 = vmatpush3.bf16.msra.mxu1 %v1945_v14 }
 0x7e7   :  { %v1842_v46 = vpop.f32.mrb[40].mxu0 }
 0x7e8   :  { %v1059_v47 = vadd.f32 %v1842_v46, %v1539_v45  ;;  %v1050_v48 = vpop.f32.mrb[41].mxu0 }
 0x7e9   :  { %v1051_v49 = vadd.f32 %v1539_v45, %v1050_v48  ;;  %v1843_v50 = vpop.f32.mrb[42].mxu0 }
 0x7ea   :  { %v1062_v51 = vadd.f32 %v1843_v50, %v1539_v45  ;;  %v1053_v52 = vpop.f32.mrb[43].mxu0  ;;  %v1083_v54 = vmax.f32 %v1059_v47, 0.0 }
 0x7eb   :  { %v1054_v53 = vadd.f32 %v1539_v45, %v1053_v52  ;;  %v1081_v56 = vmax.f32 %v1051_v49, 0.0 }
 0x7ec   :  { %v1084_v55 = vmax.f32 %v1062_v51, 0.0 }
 0x7ed   :  { %v1082_v57 = vmax.f32 %v1054_v53, 0.0 }
 0x7ee   :  { %v1090_v58 = vpack.c.bf16 %v1084_v55, %v1083_v54  ;;  %v1581_v54 = vld [vmem:[%s2236_s5 + $0x3] ss:$0 sm:$0xff] }
 0x7ef   :  { %v1089_v59 = vpack.c.bf16 %v1082_v57, %v1081_v56  ;;  %v1846_v60 = vpop.f32.mrb[44].mxu0 }
 0x7f0   :  { %v1075_v61 = vadd.f32 %v1846_v60, %v1539_v45  ;;  %v1066_v62 = vpop.f32.mrb[45].mxu0 }
 0x7f1   :  { %v1067_v63 = vadd.f32 %v1539_v45, %v1066_v62  ;;  %v1847_v0 = vpop.f32.mrb[46].mxu0  ;;  %1848 = vmatprep.subr.bf16.mxu0 %v1089_v59 }
 0x7f2   :  { %v1078_v1 = vadd.f32 %v1847_v0, %v1539_v45  ;;  %v1069_v2 = vpop.f32.mrb[47].mxu0  ;;  %1849 = vmatpush3.bf16.msra.mxu0 %v1089_v59  ;;  %v1087_v5 = vmax.f32 %v1075_v61, 0.0 }
 0x7f3   :  { %v1070_v4 = vadd.f32 %v1539_v45, %v1069_v2  ;;  %1850 = vmatprep.subr.bf16.mxu0 %v1090_v58  ;;  %v1085_v8 = vmax.f32 %v1067_v63, 0.0 }
 0x7f4   :  { %v1088_v6 = vmax.f32 %v1078_v1, 0.0 }
 0x7f5   :  { %v1086_v10 = vmax.f32 %v1070_v4, 0.0 }
 0x7f6   :  { %v1092_v11 = vpack.c.bf16 %v1088_v6, %v1087_v5  ;;  %1851 = vmatpush3.bf16.msra.mxu0 %v1090_v58 }
 0x7f7   :  { %v1091_v13 = vpack.c.bf16 %v1086_v10, %v1085_v8 }
 0x7f9   :  { %1852 = vmatprep.subr.bf16.mxu0 %v1091_v13 }
 0x7fa   :  { %1853 = vmatpush3.bf16.msra.mxu0 %v1091_v13 }
 0x7fb   :  { %1854 = vmatprep.subr.bf16.mxu0 %v1092_v11 }
 0x7fe   :  { %1855 = vmatpush3.bf16.msra.mxu0 %v1092_v11 }
 0x7ff   :  { %1888 = vmatprep.subr.bf16.mxu0 %v1946_v15 }
 0x801   :  { %1857 = vmatmul.mubr.msk.bf16.vlgmr.msra.gmra.mrb[48].mxu0 %vm106_vm0, %v2011_v7 }
 0x802   :  { %1860 = vmatprep.mubr.msk.bf16.mxu0 %vm106_vm0, %v2019_v9  ;;  %1889 = vmatpush3.bf16.msra.mxu0 %v1946_v15 }
 0x803   :  { %1890 = vmatprep.subr.bf16.mxu0 %v1947_v25 }
 0x806   :  { %1891 = vmatpush3.bf16.msra.mxu0 %v1947_v25 }
 0x809   :  { %1861 = vmatmul.mubr.msk.bf16.gmra.mrb[52].mxu0 %vm106_vm0, %v2034_v12 }
 0x8d4   :  { %v1858_v16 = vpop.f32.mrb[48].mxu0 }
 0x8d5   :  { %v1153_v7 = vpop.f32.mrb[49].mxu0 }
 0x8d6   :  { %v1859_v17 = vpop.f32.mrb[50].mxu0 }
 0x8d7   :  { %v1185_v18 = vpack.c.bf16 %v1859_v17, %v1858_v16  ;;  %v1156_v9 = vpop.f32.mrb[51].mxu0 }
 0x8d8   :  { %v1184_v19 = vpack.c.bf16 %v1156_v9, %v1153_v7 }
 0x8da   :  { %1880 = vmatprep.mubr.bf16.mxu1 %v1184_v19 }
 0x8db   :  { %1881 = vmatmul.mubr.bf16.vlgmr.msra.gmra.mrb[24].mxu1 %v1185_v18 }
 0x8dc   :  { %v1862_v12 = vpop.f32.mrb[52].mxu0 }
 0x8dd   :  { %v1169_v20 = vpop.f32.mrb[53].mxu0 }
 0x8de   :  { %v1863_v21 = vpop.f32.mrb[54].mxu0 }
 0x8df   :  { %v1187_v22 = vpack.c.bf16 %v1863_v21, %v1862_v12  ;;  %v1172_v23 = vpop.f32.mrb[55].mxu0 }
 0x8e0   :  { %v1186_v24 = vpack.c.bf16 %v1172_v23, %v1169_v20 }
 0x8e2   :  { %1884 = vmatprep.mubr.bf16.mxu1 %v1186_v24 }
 0x8e3   :  { %1885 = vmatmul.mubr.bf16.gmra.mrb[28].mxu1 %v1187_v22 }
 0x9ae   :  { %v1882_v27 = vpop.f32.mrb[24].mxu1 }
 0x9af   :  { %v1285_v28 = vadd.f32 %v1882_v27, %v1572_v26  ;;  %v1276_v29 = vpop.f32.mrb[25].mxu1 }
 0x9b0   :  { %v1277_v30 = vadd.f32 %v1572_v26, %v1276_v29  ;;  %v1883_v31 = vpop.f32.mrb[26].mxu1 }
 0x9b1   :  { %v1288_v32 = vadd.f32 %v1883_v31, %v1572_v26  ;;  %v1279_v33 = vpop.f32.mrb[27].mxu1  ;;  %v1309_v35 = vmax.f32 %v1285_v28, 0.0 }
 0x9b2   :  { %v1280_v34 = vadd.f32 %v1572_v26, %v1279_v33  ;;  %v1307_v37 = vmax.f32 %v1277_v30, 0.0 }
 0x9b3   :  { %v1310_v36 = vmax.f32 %v1288_v32, 0.0 }
 0x9b4   :  { %v1308_v38 = vmax.f32 %v1280_v34, 0.0 }
 0x9b5   :  { %v1316_v39 = vpack.c.bf16 %v1310_v36, %v1309_v35 }
 0x9b6   :  { %v1315_v40 = vpack.c.bf16 %v1308_v38, %v1307_v37  ;;  %v1886_v41 = vpop.f32.mrb[28].mxu1 }
 0x9b7   :  { %v1301_v3 = vadd.f32 %v1886_v41, %v1572_v26  ;;  %v1292_v42 = vpop.f32.mrb[29].mxu1 }
 0x9b8   :  { %v1293_v43 = vadd.f32 %v1572_v26, %v1292_v42  ;;  %v1887_v44 = vpop.f32.mrb[30].mxu1  ;;  %1892 = vmatprep.mubr.msk.bf16.mxu0 %vm337_vm1, %v1315_v40 }
 0x9b9   :  { %v1304_v45 = vadd.f32 %v1887_v44, %v1572_v26  ;;  %v1295_v46 = vpop.f32.mrb[31].mxu1  ;;  %1893 = vmatmul.mubr.msk.bf16.vlgmr.msra.gmra.mrb[56].mxu0 %vm337_vm1, %v1316_v39  ;;  %v1313_v48 = vmax.f32 %v1301_v3, 0.0 }
 0x9ba   :  { %v1296_v47 = vadd.f32 %v1572_v26, %v1295_v46  ;;  %v1311_v50 = vmax.f32 %v1293_v43, 0.0 }
 0x9bb   :  { %v1314_v49 = vmax.f32 %v1304_v45, 0.0 }
 0x9bc   :  { %v1312_v51 = vmax.f32 %v1296_v47, 0.0 }
 0x9bd   :  { %v1318_v52 = vpack.c.bf16 %v1314_v49, %v1313_v48 }
 0x9be   :  { %v1317_v53 = vpack.c.bf16 %v1312_v51, %v1311_v50 }
 0x9c0   :  { %1896 = vmatprep.mubr.msk.bf16.mxu0 %vm337_vm1, %v1317_v53 }
 0x9c1   :  { %1897 = vmatmul.mubr.msk.bf16.gmra.mrb[60].mxu0 %vm337_vm1, %v1318_v52 }
 0xa8c   :  { %v1894_v55 = vpop.f32.mrb[56].mxu0 }
 0xa8d   :  { %v1392_v56 = vadd.f32 %v1894_v55, %v1581_v54  ;;  %v1383_v57 = vpop.f32.mrb[57].mxu0 }
 0xa8e   :  { %v1384_v58 = vadd.f32 %v1581_v54, %v1383_v57  ;;  %v1895_v59 = vpop.f32.mrb[58].mxu0 }
 0xa8f   :  { %v1416_v60 = vmax.f32 %v1392_v56, 0.0  ;;  %v1395_v61 = vadd.f32 %v1895_v59, %v1581_v54  ;;  %v1386_v62 = vpop.f32.mrb[59].mxu0 }
 0xa90   :  { %v1414_v63 = vmax.f32 %v1384_v58, 0.0  ;;  %v1387_v0 = vadd.f32 %v1581_v54, %v1386_v62 }
 0xa91   :  { %1424 = vst [vmem:[%s2237_s6 + $0x10] sm:$0xff] %v1416_v60  ;;  %v1417_v1 = vmax.f32 %v1395_v61, 0.0 }
 0xa92   :  { %1422 = vst [vmem:[%s2237_s6] sm:$0xff] %v1414_v63  ;;  %v1415_v2 = vmax.f32 %v1387_v0, 0.0 }
 0xa93   :  { %1425 = vst [vmem:[%s2237_s6 + $0x18] sm:$0xff] %v1417_v1 }
 0xa94   :  { %1423 = vst [vmem:[%s2237_s6 + $0x8] sm:$0xff] %v1415_v2  ;;  %v1898_v4 = vpop.f32.mrb[60].mxu0 }
 0xa95   :  { %v1408_v5 = vadd.f32 %v1898_v4, %v1581_v54  ;;  %v1399_v6 = vpop.f32.mrb[61].mxu0 }
 0xa96   :  { %v1400_v8 = vadd.f32 %v1581_v54, %v1399_v6  ;;  %v1899_v10 = vpop.f32.mrb[62].mxu0 }
 0xa97   :  { %v1420_v11 = vmax.f32 %v1408_v5, 0.0  ;;  %v1411_v13 = vadd.f32 %v1899_v10, %v1581_v54  ;;  %v1402_v14 = vpop.f32.mrb[63].mxu0 }
 0xa98   :  { %v1418_v15 = vmax.f32 %v1400_v8, 0.0  ;;  %v1403_v16 = vadd.f32 %v1581_v54, %v1402_v14 }
 0xa99   :  { %1428 = vst [vmem:[%s2237_s6 + $0x30] sm:$0xff] %v1420_v11  ;;  %v1421_v7 = vmax.f32 %v1411_v13, 0.0 }
 0xa9a   :  { %1426 = vst [vmem:[%s2237_s6 + $0x20] sm:$0xff] %v1418_v15  ;;  %v1419_v17 = vmax.f32 %v1403_v16, 0.0 }
 0xa9b   :  { %1429 = vst [vmem:[%s2237_s6 + $0x38] sm:$0xff] %v1421_v7 }
 0xa9c   :  { %1427 = vst [vmem:[%s2237_s6 + $0x28] sm:$0xff] %v1419_v17 }

</bundles_post_ra>
